<compile_context>
chip_gen: v6e
topology: v6e:2x2x1
jax: 0.10.0
libtpu: 0.0.40
codegen_flags: <defaults>
</compile_context>

<pallas_src>
import jax
import jax.numpy as jnp
from jax.experimental import pallas as pl
from jax.experimental.pallas import tpu as pltpu

EPS = 1e-10          # DiceLoss eps
OHNM_RATIO = 30
DEFAULT_NEG_PERC = 0.1

# Live (double-buffered) VMEM working-set budgets + explicit scoped limit.
# 32 MiB scoped is valid on every chip (v5e/v6e: 128 MiB phys, v7x: 64 MiB).
_K1_LIVE_BUDGET = 16 * 1024 * 1024
_K2_LIVE_BUDGET = 8 * 1024 * 1024
_VMEM_LIMIT = 32 * 1024 * 1024


def _round_up(x, m):
    return (x + m - 1) // m * m


def _sublane_multiple(dtype):
    # Sub-32-bit dtypes pack along sublanes: f32 -> 8 rows, bf16 -> 16, int8 -> 32.
    itemsize = jnp.dtype(dtype).itemsize
    return 8 * max(1, 4 // itemsize)


# ----------------------------------------------------------------------------
# Kernel 1: element-wise BCE-with-logits (stable form), positives zeroed
#           (== losses.masked_fill(targs == 1, 0)) for OHNM top-k, plus a
#           fused per-tile positive count (scalar SMEM output per grid cell).
# ----------------------------------------------------------------------------
def _bce_masked_kernel(preds_ref, targs_ref, masked_ref, npos_ref):
    x = preds_ref[...].astype(jnp.float32)
    t = targs_ref[...].astype(jnp.float32)
    # Stable BCEWithLogits: max(x,0) - x*t + log1p(exp(-|x|))
    loss = jnp.maximum(x, 0.0) - x * t + jnp.log1p(jnp.exp(-jnp.abs(x)))
    # Binary targets: loss*(1-t) == masked_fill(t == 1, 0) (single VPU mul).
    # Output kept f32 so OHNM top-k tie-breaking matches the f32 reference.
    masked_ref[...] = loss * (1.0 - t)
    # Per-tile positive count: exact in f32 (tile holds < 2^24 binary elems),
    # reduces to a scalar on the XLU which is free filler in this HBM-bound
    # kernel, and saves a full extra HBM pass over targs downstream.
    npos_ref[0, 0] = jnp.sum(t)


def _pick_tr_k1(R_pad, TL, live_bpe, budget, sub_mult):
    cands = [c for c in (512, 256, 128, 64, 32, 16, 8) if c >= sub_mult]
    for c in cands:
        if R_pad % c == 0 and c * TL * live_bpe <= budget:
            return c
    return sub_mult


def _bce_masked(preds2, targs2):
    R, L = preds2.shape
    sub = max(_sublane_multiple(preds2.dtype), _sublane_multiple(targs2.dtype))
    R_pad = _round_up(R, sub)
    L_pad = _round_up(L, 128)
    if (R_pad, L_pad) != (R, L):
        preds2 = jnp.pad(preds2, ((0, R_pad - R), (0, L_pad - L)))
        targs2 = jnp.pad(targs2, ((0, R_pad - R), (0, L_pad - L)))

    # Live bytes per block element: 2 inputs + f32 output, each double-buffered.
    live_bpe = 2 * (jnp.dtype(preds2.dtype).itemsize
                    + jnp.dtype(targs2.dtype).itemsize + 4)
    TL = next(c for c in (2048, 1024, 512, 256, 128) if L_pad % c == 0)
    TR = _pick_tr_k1(R_pad, TL, live_bpe, _K1_LIVE_BUDGET, sub)
    grid = (R_pad // TR, L_pad // TL)
    # Note (v7x): with HBM at 3.2 TB/s the exp+log1p pair can bind on the EUP;
    # both axes are "parallel" so the grid shards across the 2 TensorCores
    # whenever it has >=2 steps at production sizes.

    masked, counts = pl.pallas_call(
        _bce_masked_kernel,
        grid=grid,
        in_specs=[
            pl.BlockSpec((TR, TL), lambda i, j: (i, j)),
            pl.BlockSpec((TR, TL), lambda i, j: (i, j)),
        ],
        out_specs=(
            pl.BlockSpec((TR, TL), lambda i, j: (i, j)),
            pl.BlockSpec((1, 1), lambda i, j: (i, j),
                         memory_space=pltpu.MemorySpace.SMEM),
        ),
        out_shape=(
            jax.ShapeDtypeStruct((R_pad, L_pad), jnp.float32),
            jax.ShapeDtypeStruct(grid, jnp.float32),
        ),
        compiler_params=pltpu.CompilerParams(
            dimension_semantics=("parallel", "parallel"),
            vmem_limit_bytes=_VMEM_LIMIT),
    )(preds2, targs2)

    if (R_pad, L_pad) != (R, L):
        # Padding cells hold log(2); slice BEFORE top_k so they cannot be picked.
        masked = masked[:R, :L]
    # Per-tile counts are exact f32 integers; sum them as int32 for an exact
    # global positive count.
    n_pos = int(jnp.sum(jnp.round(counts).astype(jnp.int32)))
    return masked, n_pos


# ----------------------------------------------------------------------------
# Kernel 2: sigmoid + per-row dice reductions + per-row selected-BCE sums.
#           Grid: (row blocks "parallel", K blocks "arbitrary" reduction).
# ----------------------------------------------------------------------------
def _make_tail_kernel(K, TK, needs_tail_mask):
    tail_valid_cols = K % TK  # static; only used when needs_tail_mask

    def kernel(preds_ref, targs_ref, dice_ref, bce_ref,
               inter_acc, denom_acc, bce_acc):
        kb = pl.program_id(1)
        last_k = pl.num_programs(1) - 1

        @pl.when(kb == 0)
        def _init():
            inter_acc[...] = jnp.zeros_like(inter_acc)
            denom_acc[...] = jnp.zeros_like(denom_acc)
            bce_acc[...] = jnp.zeros_like(bce_acc)

        x = preds_ref[...].astype(jnp.float32)      # (TR, TK) logits
        t = targs_ref[...].astype(jnp.float32)
        # Exact sigmoid so dice matches the f32 reference within tight tol;
        # pl.reciprocal(..., approx=True) would free VALU slots but perturbs
        # low bits of the dice score.
        p = 1.0 / (1.0 + jnp.exp(-x))
        bce = jnp.maximum(x, 0.0) - x * t + jnp.log1p(jnp.exp(-jnp.abs(x)))

        def _accumulate(pv, tv, bcev):
            inter_acc[...] += jnp.sum(pv * tv, axis=1, keepdims=True)
            # psum/tsum merged: dice only uses their sum -> one fewer XLU
            # reduction per tile and one fewer VMEM scratch buffer.
            denom_acc[...] += jnp.sum(pv + tv, axis=1, keepdims=True)
            bce_acc[...] += jnp.sum(bcev, axis=1, keepdims=True)

        if needs_tail_mask:
            # Only the (statically known) last K tile has padded columns;
            # full tiles skip the iota/compare/mask-multiply work entirely.
            @pl.when(kb != last_k)
            def _full_tile():
                _accumulate(p, t, bce)

            @pl.when(kb == last_k)
            def _tail_tile():
                col = jax.lax.broadcasted_iota(jnp.int32, x.shape, 1)
                valid = (col < tail_valid_cols).astype(jnp.float32)
                _accumulate(valid * p, valid * t, valid * bce)
        else:
            _accumulate(p, t, bce)

        @pl.when(kb == last_k)
        def _finalize():
            dice_ref[...] = 1.0 - (2.0 * inter_acc[...] + EPS) / (
                denom_acc[...] + EPS)
            bce_ref[...] = bce_acc[...]

    return kernel


def _pick_tiles_k2(R_pad, K_pad, live_bpe, budget, sub_mult):
    tr_cands = [c for c in (256, 128, 64, 32, 16, 8) if c >= sub_mult]
    for TK in (2048, 1024, 512, 256, 128):
        if K_pad % TK:
            continue
        for TR in tr_cands:
            if R_pad % TR == 0 and TR * TK * live_bpe <= budget:
                return TR, TK
    return sub_mult, 128  # always fits; R_pad/K_pad are multiples by construction


def _dice_plus_bce_mean(preds_sel, targs_sel, R, K):
    sub = max(_sublane_multiple(preds_sel.dtype),
              _sublane_multiple(targs_sel.dtype))
    R_pad = _round_up(R, sub)
    K_pad = _round_up(K, 128)   # lane-dense blocks; tail padding masked in-kernel
    if (R_pad, K_pad) != (R, K):
        preds_sel = jnp.pad(preds_sel, ((0, R_pad - R), (0, K_pad - K)))
        targs_sel = jnp.pad(targs_sel, ((0, R_pad - R), (0, K_pad - K)))

    live_bpe = 2 * (jnp.dtype(preds_sel.dtype).itemsize
                    + jnp.dtype(targs_sel.dtype).itemsize)
    TR, TK = _pick_tiles_k2(R_pad, K_pad, live_bpe, _K2_LIVE_BUDGET, sub)
    grid = (R_pad // TR, K_pad // TK)          # reduction axis (K) last
    needs_tail_mask = (K % TK != 0)
    # TODO(synk): sweep pipeline_mode=pl.Buffered(3) on the in_specs if
    # profiling shows exposed DMA (compute per tile is only sigmoid + 3 sums).

    dice_rows, bce_rows = pl.pallas_call(
        _make_tail_kernel(K, TK, needs_tail_mask),
        grid=grid,
        in_specs=[
            pl.BlockSpec((TR, TK), lambda i, k: (i, k)),
            pl.BlockSpec((TR, TK), lambda i, k: (i, k)),
        ],
        out_specs=(
            pl.BlockSpec((TR, 1), lambda i, k: (i, 0)),
            pl.BlockSpec((TR, 1), lambda i, k: (i, 0)),
        ),
        out_shape=(
            jax.ShapeDtypeStruct((R_pad, 1), jnp.float32),
            jax.ShapeDtypeStruct((R_pad, 1), jnp.float32),
        ),
        scratch_shapes=[pltpu.VMEM((TR, 1), jnp.float32)] * 3,
        compiler_params=pltpu.CompilerParams(
            dimension_semantics=("parallel", "arbitrary"),
            vmem_limit_bytes=_VMEM_LIMIT),
    )(preds_sel, targs_sel)

    # Tiny O(R) epilogue: drop padded rows, take means.
    dice_mean = jnp.mean(dice_rows[:R, 0])
    bce_mean = jnp.sum(bce_rows[:R, 0]) / (R * K)
    return dice_mean + bce_mean


# ----------------------------------------------------------------------------
# Full forward (matches DiceBCE_OHNMLoss()(preds, targs) with defaults).
# ----------------------------------------------------------------------------
def dice_bce_ohnm_loss(preds, targs,
                       ohnm_ratio=OHNM_RATIO,
                       default_neg_perc=DEFAULT_NEG_PERC):
    assert preds.ndim > 2 and preds.shape == targs.shape
    B, C = preds.shape[:2]
    R = B * C
    L = 1
    for d in preds.shape[2:]:
        L *= d
    preds2 = preds.reshape(R, L)       # native dtype; cast to f32 in-kernel
    targs2 = targs.reshape(R, L)

    # Hot path 1: elementwise BCE-with-logits + hard-negative masking, with
    # the positive count fused in (no separate full pass over targs).
    masked2, n_pos = _bce_masked(preds2, targs2)

    # OHNM selection: the number of selected voxels is data-dependent, exactly
    # like torch's .item() / dynamic topk / nonzero in the reference module,
    # so it stays host-driven glue on concrete arrays.
    # TODO(synk): a fully-jittable variant needs a static K cap + validity
    # masking, but exact parity with torch's dynamic `.view(B, C, -1)` row
    # partition requires the runtime K, so the host sync is kept here.
    n_total = R * L
    n_neg = n_total - n_pos
    if n_pos == 0:
        n_hns = int(default_neg_perc * n_neg)
    else:
        n_hns = min(n_pos * ohnm_ratio, n_neg)

    _, hns_idxs = jax.lax.top_k(masked2.reshape(-1), n_hns)
    targs_flat = targs2.reshape(-1)
    pos_idxs = jnp.nonzero(targs_flat == 1, size=n_pos)[0]
    idxs = jnp.concatenate([hns_idxs.astype(jnp.int32),
                            pos_idxs.astype(jnp.int32)])

    k_total = n_hns + n_pos
    # Same implicit constraint as torch's `.view(B, C, -1)`.
    assert k_total % R == 0, "selected voxel count must divide B*C"
    K = k_total // R

    preds_sel = preds2.reshape(-1)[idxs].reshape(R, K)
    targs_sel = targs_flat[idxs].reshape(R, K)

    # Hot path 2: sigmoid + dice reductions + selected-BCE sums (Pallas).
    return _dice_plus_bce_mean(preds_sel, targs_sel, R, K)


# ----------------------------------------------------------------------------
# Pure-JAX reference (mirrors the PyTorch module) for a correctness check.
# ----------------------------------------------------------------------------
def _reference(preds, targs,
               ohnm_ratio=OHNM_RATIO,
               default_neg_perc=DEFAULT_NEG_PERC):
    B, C = preds.shape[:2]
    R = B * C
    x = preds.astype(jnp.float32).reshape(-1)
    t = targs.astype(jnp.float32).reshape(-1)
    losses = jnp.maximum(x, 0.0) - x * t + jnp.log1p(jnp.exp(-jnp.abs(x)))
    masked = jnp.where(t == 1.0, 0.0, losses)

    n_pos = int(jnp.sum(t))
    n_neg = t.size - n_pos
    n_hns = int(default_neg_perc * n_neg) if n_pos == 0 else min(n_pos * ohnm_ratio, n_neg)
    _, hns_idxs = jax.lax.top_k(masked, n_hns)
    pos_idxs = jnp.nonzero(t == 1.0, size=n_pos)[0]
    idxs = jnp.concatenate([hns_idxs.astype(jnp.int32), pos_idxs.astype(jnp.int32)])
    K = (n_hns + n_pos) // R

    ps = 1.0 / (1.0 + jnp.exp(-x[idxs].reshape(R, K)))
    ts = t[idxs].reshape(R, K)
    ls = losses[idxs]
    inter = jnp.sum(ps * ts, axis=1)
    denom = jnp.sum(ps, axis=1) + jnp.sum(ts, axis=1)
    dice = jnp.mean(1.0 - (2.0 * inter + EPS) / (denom + EPS))
    return dice + jnp.mean(ls)


if __name__ == "__main__":
    key = jax.random.PRNGKey(0)
    kp, kt = jax.random.split(key)
    B, C, H, W = 2, 4, 16, 16

    # Logit predictions.
    preds = jax.random.normal(kp, (B, C, H, W), dtype=jnp.float32)
    # Binary targets with exactly 8 positives so (n_pos*30 + n_pos) % (B*C) == 0,
    # matching the divisibility torch's `.view(B, C, -1)` requires.
    n_pos = 8
    pos_locs = jax.random.choice(kt, B * C * H * W, (n_pos,), replace=False)
    targs = (jnp.zeros((B * C * H * W,), jnp.float32)
             .at[pos_locs].set(1.0)
             .reshape(B, C, H, W))

    out = dice_bce_ohnm_loss(preds, targs)
    out = jax.block_until_ready(out)

    ref = _reference(preds, targs)
    assert jnp.allclose(out, ref, atol=1e-5, rtol=1e-5), (float(out), float(ref))
    print("KERNEL_OK")
</pallas_src>

<mosaic_0001>
module attributes {stable_mosaic.version = 11 : i64} {
  func.func @_bce_masked_kernel(%arg0: i32, %arg1: i32, %arg2: memref<8x256xf32, #tpu.memory_space<vmem>>, %arg3: memref<8x256xf32, #tpu.memory_space<vmem>>, %arg4: memref<8x256xf32, #tpu.memory_space<vmem>>, %arg5: memref<1x1xf32, #tpu.memory_space<smem>>) attributes {dimension_semantics = [#tpu.dimension_semantics<parallel>, #tpu.dimension_semantics<parallel>], iteration_bounds = array<i64: 1, 1>, scalar_prefetch = 0 : i64, scratch_operands = 0 : i64, tpu.core_type = #tpu.core_type<tc>, window_params = [{transform_indices = @transform_0, window_bounds = array<i64: 8, 256>}, {transform_indices = @transform_1, window_bounds = array<i64: 8, 256>}, {transform_indices = @transform_2, window_bounds = array<i64: 8, 256>}, {transform_indices = @transform_3, window_bounds = array<i64: 1, 1>}]} {
    %c0 = arith.constant 0 : index
    %c0_0 = arith.constant 0 : index
    %0 = vector.load %arg2[%c0, %c0_0] : memref<8x256xf32, #tpu.memory_space<vmem>>, vector<8x256xf32>
    %c0_1 = arith.constant 0 : index
    %c0_2 = arith.constant 0 : index
    %1 = vector.load %arg3[%c0_1, %c0_2] : memref<8x256xf32, #tpu.memory_space<vmem>>, vector<8x256xf32>
    %cst = arith.constant 0.000000e+00 : f32
    %2 = vector.broadcast %cst : f32 to vector<8x256xf32>
    %3 = arith.maximumf %0, %2 : vector<8x256xf32>
    %4 = arith.mulf %0, %1 : vector<8x256xf32>
    %5 = arith.subf %3, %4 : vector<8x256xf32>
    %6 = math.absf %0 : vector<8x256xf32>
    %cst_3 = arith.constant 0.000000e+00 : f32
    %7 = vector.broadcast %cst_3 : f32 to vector<8x256xf32>
    %8 = arith.subf %7, %6 : vector<8x256xf32>
    %9 = math.exp %8 : vector<8x256xf32>
    %10 = math.log1p %9 : vector<8x256xf32>
    %11 = arith.addf %5, %10 : vector<8x256xf32>
    %cst_4 = arith.constant 1.000000e+00 : f32
    %12 = vector.broadcast %cst_4 : f32 to vector<8x256xf32>
    %13 = arith.subf %12, %1 : vector<8x256xf32>
    %14 = arith.mulf %11, %13 : vector<8x256xf32>
    %c0_5 = arith.constant 0 : index
    %c0_6 = arith.constant 0 : index
    %15 = vector.load %arg4[%c0_5, %c0_6] : memref<8x256xf32, #tpu.memory_space<vmem>>, vector<8x256xf32>
    tpu.vector_store %arg4[%c0_5, %c0_6], %14 {strides = array<i32>} : memref<8x256xf32, #tpu.memory_space<vmem>>, vector<8x256xf32>,
    %16 = vector.shape_cast %1 : vector<8x256xf32> to vector<1x8x256xf32>
    %cst_7 = arith.constant dense<0.000000e+00> : vector<1xf32>
    %17 = vector.multi_reduction <add>, %16, %cst_7 [1, 2] : vector<1x8x256xf32> to vector<1xf32>
    %18 = vector.shape_cast %17 : vector<1xf32> to vector<1x1x1xf32>
    %19 = vector.extract %18[0, 0, 0] : f32 from vector<1x1x1xf32>
    %c0_8 = arith.constant 0 : index
    %c0_9 = arith.constant 0 : index
    %20 = memref.load %arg5[%c0_8, %c0_9] : memref<1x1xf32, #tpu.memory_space<smem>>
    memref.store %19, %arg5[%c0_8, %c0_9] : memref<1x1xf32, #tpu.memory_space<smem>>
    return
  }
  func.func @transform_0(%arg0: i32, %arg1: i32) -> (i32, i32) {
    %c0_i32 = arith.constant 0 : i32
    return %arg0, %arg1 : i32, i32
  }
  func.func @transform_1(%arg0: i32, %arg1: i32) -> (i32, i32) {
    %c0_i32 = arith.constant 0 : i32
    return %arg0, %arg1 : i32, i32
  }
  func.func @transform_2(%arg0: i32, %arg1: i32) -> (i32, i32) {
    %c0_i32 = arith.constant 0 : i32
    return %arg0, %arg1 : i32, i32
  }
  func.func @transform_3(%arg0: i32, %arg1: i32) -> (i32, i32) {
    %c0_i32 = arith.constant 0 : i32
    return %arg0, %arg1 : i32, i32
  }
}

</mosaic_0001>

<bundles_post_ra>
// kernel: tpu_custom_call.1
= control target key start
LH: loop header
LB: loop body
LE: loop exit
PB: predicated region body
PF: predicated region fallthrough
CT: control target
= control target key end

     0   :  { %9 = vsyncpa [#allocation3], 0  ;;  %s250_s0 = inlined_call_operand.hbm [shape: f32[8,256], index: 0, kind: input, shape index: {}]   ;;  %s251_s1 = inlined_call_operand.hbm [shape: f32[8,256], index: 1, kind: input, shape index: {}]   ;;  %s252_s2 = inlined_call_operand.hbm [shape: f32[8,256], index: 2, kind: output, shape index: {0}]   ;;  %s253_s3 = inlined_call_operand.hbm [shape: f32[1,1], index: 3, kind: output, shape index: {1}]  }
   0x1   :  { %10 = vsyncpa [#allocation7], 0 }
   0x2   :  { %11 = vsyncpa [#allocation4], 0 }
   0x3   :  { %12 = vsyncpa [#allocation5], 0  ;;  %s214_s12 = smov [#allocation2]   ;;  %s215_s14 = smov [#allocation6]  }
   0x4   :  { %s19_s13 = sshll.u32 %s214_s12, 4  ;;  %s29_s15 = sshll.u32 %s215_s14, 4  ;;  %s20_s13 = int_to_ptr.vmem [resolvable:$true] %s19_s13  ;;  %s30_s15 = int_to_ptr.vmem [resolvable:$true] %s29_s15 }
   0x5   :  { %s146_s16 = scalar_lea.vmem %s20_s13, 256  ;;  %p151_p1 = scmp.lt.s32.totalorder %s20_s13, %s20_s13 }
   0x6   :  { %p147_p0 = scmp.ne.s32.totalorder %s20_s13, %s146_s16  ;;  %p152_p2 = scmp.lt.s32.totalorder %s146_s16, %s146_s16 }
   0x8   :  { %p153_p3 = por %p152_p2, %p151_p1 }
   0xa   :  { %p154_p4 = pnand %p153_p3, %p147_p0 }
   0xc   :  { %157 = shalt.err (!%p154_p4)
}
   0xd   :  { %22 = dma.hbm_to_vmem [thread:$0]  %s250_s0, 256, %s20_s13, [#allocation3]  }
   0xe   :  { %s166_s19 = scalar_lea.vmem %s30_s15, 256  ;;  %p171_p6 = scmp.lt.s32.totalorder %s30_s15, %s30_s15 }
   0xf   :  { %p167_p5 = scmp.ne.s32.totalorder %s30_s15, %s166_s19  ;;  %p172_p7 = scmp.lt.s32.totalorder %s166_s19, %s166_s19 }
  0x11   :  { %p173_p8 = por %p172_p7, %p171_p6 }
  0x13   :  { %p174_p9 = pnand %p173_p8, %p167_p5 }
  0x15   :  { %177 = shalt.err (!%p174_p9)
}
  0x16   :  { %32 = dma.hbm_to_vmem [thread:$0]  %s251_s1, 256, %s30_s15, [#allocation7]  }
  0x17   :  { %206 = dma.done.wait [#allocation3], 256  }
  0x18   :  { %207 = vsyncadd [#allocation3], 4294967040 }
  0x19   :  { %208 = dma.done.wait [#allocation7], 256  }
  0x1a   :  { %209 = vsyncadd [#allocation7], 4294967040  ;;  %v41_v0 = vld [vmem:[#allocation6] sm:$0xff]  ;;  %v42_v1 = vld [vmem:[#allocation6 + $0x8] sm:$0xff]  ;;  %s216_s0 = smov [#allocation8]  }
  0x1b   :  { %v83_v2 = vadd.f32 %v42_v1, %v41_v0  ;;  %v39_v3 = vld [vmem:[#allocation2] sm:$0xff]  ;;  %v40_v4 = vld [vmem:[#allocation2 + $0x8] sm:$0xff]  ;;  %v77_v25 = vsub.f32 1.0, %v41_v0  ;;  %v78_v34 = vsub.f32 1.0, %v42_v1  ;;  %s101_s1 = sshll.u32 %s216_s0, 4  ;;  %s102_s1 = int_to_ptr.vmem [resolvable:$true] %s101_s1 }
  0x1c   :  { %v49_v5 = vand.u32 2147483647, %v39_v3  ;;  %v50_v6 = vand.u32 2147483647, %v40_v4  ;;  %v43_v15 = vmax.f32 %v39_v3, 0.0  ;;  %v45_v16 = vmul.f32 %v41_v0, %v39_v3  ;;  %s178_s22 = scalar_lea.vmem %s102_s1, 256  ;;  %p183_p11 = scmp.lt.s32.totalorder %s102_s1, %s102_s1 }
  0x1d   :  { %84 = vadd.xlane.f32.xlu0 %v83_v2  ;;  %v44_v17 = vmax.f32 %v40_v4, 0.0  ;;  %v46_v18 = vmul.f32 %v42_v1, %v40_v4  ;;  %p179_p10 = scmp.ne.s32.totalorder %s102_s1, %s178_s22  ;;  %p184_p12 = scmp.lt.s32.totalorder %s178_s22, %s178_s22 }
  0x1e   :  { %v51_v7 = vsub.f32 0.0, %v49_v5  ;;  %v52_v8 = vsub.f32 0.0, %v50_v6  ;;  %v47_v24 = vsub.f32 %v43_v15, %v45_v16 }
  0x1f   :  { %v48_v29 = vsub.f32 %v44_v17, %v46_v18  ;;  %p185_p13 = por %p184_p12, %p183_p11 }
  0x20   :  { %v53_v9 = vmul.f32 1.442695, %v51_v7  ;;  %v55_v10 = vmul.f32 1.442695, %v52_v8 }
  0x21   :  { %p186_p0 = pnand %p185_p13, %p179_p10 }
  0x22   :  { %130 = vpow2.f32 %v53_v9 }
  0x23   :  { %132 = vpow2.f32 %v55_v10 }
  0x2f   :  { %v131_v11 = vpop.eup %130 }
  0x30   :  { %v133_v12 = vpop.eup %132  ;;  %v57_v13 = vadd.f32 1.0, %v131_v11  ;;  %v60_v19 = vmul.f32 -0.5, %v131_v11  ;;  %v63_v26 = vand.u32 2147483647, %v131_v11 }
  0x31   :  { %v66_v14 = vadd.f32 1.0, %v133_v12  ;;  %v69_v20 = vmul.f32 -0.5, %v133_v12  ;;  %v72_v27 = vand.u32 2147483647, %v133_v12 }
  0x32   :  { %134 = vlog2.f32 %v57_v13  ;;  %v61_v21 = vadd.f32 1.0, %v60_v19  ;;  %vm64_vm0 = vcmp.lt.f32.partialorder %v63_v26, 0.0004427343 }
  0x33   :  { %136 = vlog2.f32 %v66_v14  ;;  %v70_v22 = vadd.f32 1.0, %v69_v20  ;;  %vm73_vm1 = vcmp.lt.f32.partialorder %v72_v27, 0.0004427343 }
  0x34   :  { %v62_v31 = vmul.f32 %v131_v11, %v61_v21 }
  0x35   :  { %v71_v32 = vmul.f32 %v133_v12, %v70_v22 }
  0x3f   :  { %v135_v23 = vpop.eup %134 }
  0x40   :  { %v137_v28 = vpop.eup %136  ;;  %v59_v30 = vmul.f32 0.6931472, %v135_v23 }
  0x41   :  { %v68_v33 = vmul.f32 0.6931472, %v137_v28 }
  0x42   :  { %v65_v35 = vsel %vm64_vm0, %v62_v31, %v59_v30 }
  0x43   :  { %v74_v36 = vsel %vm73_vm1, %v71_v32, %v68_v33  ;;  %v75_v37 = vadd.f32 %v65_v35, %v47_v24 }
  0x44   :  { %v76_v38 = vadd.f32 %v74_v36, %v48_v29 }
  0x45   :  { %v79_v39 = vmul.f32 %v77_v25, %v75_v37 }
  0x46   :  { %v80_v40 = vmul.f32 %v78_v34, %v76_v38 }
  0x47   :  { %81 = vst [vmem:[#allocation8] sm:$0xff] %v79_v39 }
  0x48   :  { %82 = vst [vmem:[#allocation8 + $0x8] sm:$0xff] %v80_v40 }
  0x49   :  { %189 = shalt.err (!%p186_p0)
}
  0x4a   :  { %104 = dma.vmem_to_hbm [thread:$0]  %s102_s1, 256, %s252_s2, [#allocation4]  }
  0x4b   :  { %s217_s26 = smov [#allocation9]  }
  0xa6   :  { %v85_v41 = vpop.xlane.xlu0 %84 }
  0xa7   :  { %v86_v42 = vrot.slane %v85_v41, 4 }
  0xa9   :  { %v87_v43 = vadd.f32 %v86_v42, %v85_v41 }
  0xab   :  { %v88_v44 = vrot.slane %v87_v43, 2 }
  0xad   :  { %v89_v45 = vadd.f32 %v88_v44, %v87_v43 }
  0xaf   :  { %v90_v46 = vrot.slane %v89_v45, 1 }
  0xb1   :  { %v91_v47 = vadd.f32 %v90_v46, %v89_v45 }
  0xb3   :  { %124 = vpush %v91_v47 }
  0xe4   :  { %s125_s25 = spop %124 }
  0xe5   :  { %94 = sst [smem:[#allocation9]] %s125_s25 }
  0xe6   :  { %112 = dma.smem_to_hbm %s217_s26, 16, %s253_s3, [#allocation5]  }
  0xe7   :  { %210 = dma.done.wait [#allocation4], 256  }
  0xe8   :  { %211 = vsyncadd [#allocation4], 4294967040 }
  0xe9   :  { %212 = dma.done.wait [#allocation5], 16  }
  0xea   :  { %213 = vsyncadd [#allocation5], 4294967280 }
  0xeb   :  { %119 = sfence }
  0xec   :  { %120 = vsyncpa [#allocation3], 1 }
  0xed   :  { %121 = vsyncpa [#allocation7], 1 }
  0xee   :  { %122 = vsyncpa [#allocation4], 1 }
  0xef   :  { %123 = vsyncpa [#allocation5], 1 }

</bundles_post_ra>
